<compile_context>
chip_gen: v6e
topology: v6e:2x2x1
jax: 0.10.0
libtpu: 0.0.40
codegen_flags: <defaults>
</compile_context>

<pallas_src>
import functools

import jax
import jax.numpy as jnp
from jax import lax
from jax.experimental import pallas as pl
from jax.experimental.pallas import tpu as pltpu

KEYWORDS_FOR_STARTS_WITH = ['Province', 'City', 'Municipality', 'Barangay', 'Zone', 'Street']
_feature_order_for_len_calc = (
    ['num_cells_in_row', 'first_non_null_column', 'last_non_null_column',
     'num_non_empty_cells', 'ratio_non_empty_cells', 'num_numeric_cells',
     'ratio_numeric_cells', 'is_row_empty_or_whitespace_only', 'contains_keyword_zv']
    + [f"starts_with_keyword_{kw.lower().replace(' ', '_')}" for kw in KEYWORDS_FOR_STARTS_WITH]
)
N_NUMERIC_FEATURES = len(_feature_order_for_len_calc)  # 15
LN_EPS = 1e-5

_ROW_GROUP = 128  # original rows packed per lane-dense row (F * 128 lanes => multiple of 128)


# ----------------------------------------------------------------------------- helpers
def _round_up(n, m):
    return ((n + m - 1) // m) * m


def _min_sublane(dtype):
    # f32 -> 8, bf16/f16 -> 16, int8/fp8 -> 32
    return max(8, 32 // jnp.dtype(dtype).itemsize)


def _num_tensorcores():
    """Best-effort TensorCore count (v7x=2, v5e/v6e=1); defaults to 1 on failure."""
    try:
        info = pltpu.get_tpu_info()
        for name in ("num_cores", "core_count", "num_tensorcores",
                     "tensorcores_per_chip", "cores_per_chip"):
            v = getattr(info, name, None)
            if isinstance(v, int) and v > 0:
                return v
    except Exception:
        pass
    try:
        v = getattr(jax.devices()[0], "num_cores", None)
        if isinstance(v, int) and v > 0:
            return v
    except Exception:
        pass
    return 1


def _pick_tile(n, unit, max_tile, n_cores):
    """Row-tile choice: as large as allowed (mem-bound), multiple of `unit`,
    and -- only on multi-TC parts -- a core-count-rounded (even on v7x) number of
    grid steps so both TensorCores stay busy under dimension_semantics=("parallel",)."""
    if n < unit:
        return max(n, 1)                      # full extent (allowed: equals array dim)
    max_tile = max(unit, min(_round_up(max_tile, unit), _round_up(n, unit)))
    if n_cores > 1 and n > unit:
        steps = _round_up(max(2, pl.cdiv(n, max_tile)), n_cores)
        tile = _round_up(pl.cdiv(n, steps), unit)
        return max(unit, min(tile, max_tile))
    return max_tile


def _vmem_limit_bytes(*buffer_bytes):
    """Double-buffered pipeline buffers + headroom; floor at the 32 MiB scoped
    default, cap safely below v7x's 64 MiB physical VMEM."""
    need = 2 * sum(int(b) for b in buffer_bytes) + (8 << 20)
    return int(min(48 << 20, max(32 << 20, need)))


# ----------------------------------------------------------------------------- kernels
def _ln_rowtile_kernel(x_ref, g_ref, b_ref, o_ref):
    """Lane-sparse fallback: x_ref is a (TM, F) tile of independent rows."""
    x = x_ref[...].astype(jnp.float32)
    inv_f = jnp.float32(1.0 / x.shape[-1])              # compile-time constant, no divides
    mean = jnp.sum(x, axis=-1, keepdims=True) * inv_f
    xc = x - mean                                        # two-pass (centered) variance
    var = jnp.sum(xc * xc, axis=-1, keepdims=True) * inv_f
    inv = lax.rsqrt(var + LN_EPS)
    o_ref[...] = (xc * inv * g_ref[...] + b_ref[...]).astype(o_ref.dtype)
    # NOTE: in a ragged last block the padded rows hold garbage; their writes are
    # clipped by Pallas and rows are independent, so the visible output is correct.


def _ln_lane_dense_kernel(x_ref, s_ref, st_ref, g_ref, b_ref, o_ref):
    """Lane-dense path: x_ref is (TM, 128*F); every lane-dense row packs 128
    original rows back-to-back.  Per-original-row reductions and broadcast-back
    are MXU matmuls with a constant 0/1 segment matrix."""
    x = x_ref[...].astype(jnp.float32)                    # (TM, 128*F)
    S = s_ref[...]                                        # (128*F, 128)  reduce
    ST = st_ref[...]                                      # (128, 128*F)  broadcast back
    n_feat = x.shape[-1] // S.shape[-1]                   # = F
    inv_f = jnp.float32(1.0 / n_feat)

    mean = jnp.dot(x, S, preferred_element_type=jnp.float32) * inv_f        # (TM, 128)
    mean_b = jnp.dot(mean, ST, preferred_element_type=jnp.float32)          # (TM, 128*F)
    xc = x - mean_b                                                          # two-pass variance
    var = jnp.dot(xc * xc, S, preferred_element_type=jnp.float32) * inv_f   # (TM, 128)
    inv = lax.rsqrt(var + LN_EPS)
    inv_b = jnp.dot(inv, ST, preferred_element_type=jnp.float32)            # (TM, 128*F)

    o_ref[...] = (xc * inv_b * g_ref[...] + b_ref[...]).astype(o_ref.dtype)


# ----------------------------------------------------------------------------- wrappers
def _ln_lane_sparse(x2, g32, b32, rows, F, itemsize, n_cores, tile_rows):
    unit = _min_sublane(x2.dtype)
    tm = _pick_tile(rows, unit, tile_rows, n_cores)
    grid = (pl.cdiv(rows, tm),)
    # (tm, F) block occupies tm*128*itemsize in VMEM (15 lanes pad to 128).
    padded_blk = tm * 128 * itemsize
    cost = pl.CostEstimate(flops=int(10 * rows * F), transcendentals=int(rows),
                           bytes_accessed=int(2 * rows * F * itemsize))
    return pl.pallas_call(
        _ln_rowtile_kernel,
        out_shape=jax.ShapeDtypeStruct((rows, F), x2.dtype),
        grid=grid,
        in_specs=[
            pl.BlockSpec((tm, F), lambda i: (i, 0)),
            pl.BlockSpec((1, F), lambda i: (0, 0)),
            pl.BlockSpec((1, F), lambda i: (0, 0)),
        ],
        out_specs=pl.BlockSpec((tm, F), lambda i: (i, 0)),
        compiler_params=pltpu.CompilerParams(
            dimension_semantics=("parallel",),
            vmem_limit_bytes=_vmem_limit_bytes(padded_blk, padded_blk)),
        cost_estimate=cost,
    )(x2, g32.reshape(1, F), b32.reshape(1, F))


def _ln_lane_dense(x2, g32, b32, rows, F, itemsize, n_cores, dense_block_rows):
    lanes = _ROW_GROUP * F                   # 1920 for F=15
    R = rows // _ROW_GROUP
    xd = x2.reshape(R, lanes)                # zero-cost: identical row-major layout

    # Constant segment matrices (compile-time constants under jit):
    #   S[l, j]  = 1 iff lane l belongs to original row j of its 128-row group.
    lane_row = (jnp.arange(lanes, dtype=jnp.int32) // F)[:, None]
    col = jnp.arange(_ROW_GROUP, dtype=jnp.int32)[None, :]
    S = (lane_row == col).astype(jnp.float32)             # (lanes, 128): segment reduce
    ST = S.T                                               # (128, lanes): broadcast back

    gt = jnp.tile(g32, _ROW_GROUP).reshape(1, lanes)       # gamma[l % F]
    bt = jnp.tile(b32, _ROW_GROUP).reshape(1, lanes)       # beta[l % F]

    unit = _min_sublane(x2.dtype)
    tm = _pick_tile(R, unit, max(1, dense_block_rows // _ROW_GROUP), n_cores)
    grid = (pl.cdiv(R, tm),)

    blk_bytes = tm * lanes * itemsize                      # no lane padding in VMEM
    vmem_limit = _vmem_limit_bytes(blk_bytes, blk_bytes, S.size * 4, ST.size * 4)
    flops = 4 * 2 * R * lanes * _ROW_GROUP + 8 * rows * F  # 4 segment matmuls + elementwise
    cost = pl.CostEstimate(flops=int(flops), transcendentals=int(rows),
                           bytes_accessed=int(2 * rows * F * itemsize))

    out = pl.pallas_call(
        _ln_lane_dense_kernel,
        out_shape=jax.ShapeDtypeStruct((R, lanes), x2.dtype),
        grid=grid,
        in_specs=[
            pl.BlockSpec((tm, lanes), lambda i: (i, 0)),
            pl.BlockSpec((lanes, _ROW_GROUP), lambda i: (0, 0)),   # resident constants
            pl.BlockSpec((_ROW_GROUP, lanes), lambda i: (0, 0)),
            pl.BlockSpec((1, lanes), lambda i: (0, 0)),
            pl.BlockSpec((1, lanes), lambda i: (0, 0)),
        ],
        out_specs=pl.BlockSpec((tm, lanes), lambda i: (i, 0)),
        compiler_params=pltpu.CompilerParams(
            dimension_semantics=("parallel",),
            vmem_limit_bytes=vmem_limit),
        cost_estimate=cost,
    )(xd, S, ST, gt, bt)
    return out.reshape(rows, F)


@functools.partial(jax.jit, static_argnames=("tile_rows", "dense_block_rows"))
def numeric_feature_extractor(x, gamma, beta, *, tile_rows=8192, dense_block_rows=32768):
    """LayerNorm over the last dim of x (== NumericFeatureExtractor.forward).

    tile_rows:        lane-sparse row tile (padded VMEM footprint tm*128*itemsize;
                      8192 keeps the v7x 64 MiB cap comfortable, v6e can take 16384).
    dense_block_rows: original rows per lane-dense grid step (32768 -> ~1.9 MiB block).
    """
    orig_shape = x.shape
    F = orig_shape[-1]
    rows = 1
    for d in orig_shape[:-1]:
        rows *= d
    x2 = x.reshape(rows, F)
    itemsize = jnp.dtype(x.dtype).itemsize
    n_cores = _num_tensorcores()

    g32 = gamma.astype(jnp.float32)
    b32 = beta.astype(jnp.float32)

    if rows >= _ROW_GROUP and rows % _ROW_GROUP == 0:
        # Lane-dense fast path: free reshape, full-width stores, MXU segment sums.
        out = _ln_lane_dense(x2, g32, b32, rows, F, itemsize, n_cores, dense_block_rows)
    else:
        # Ragged row counts: padding/splitting would cost extra HBM passes that
        # outweigh lane-density; keep the large-tile lane-sparse kernel.
        out = _ln_lane_sparse(x2, g32, b32, rows, F, itemsize, n_cores, tile_rows)

    return out.reshape(orig_shape)


# ----------------------------------------------------------------------------- reference
def _layernorm_ref(x, gamma, beta):
    xf = x.astype(jnp.float32)
    mean = jnp.mean(xf, axis=-1, keepdims=True)
    var = jnp.mean((xf - mean) ** 2, axis=-1, keepdims=True)
    return ((xf - mean) * lax.rsqrt(var + LN_EPS) * gamma + beta).astype(x.dtype)


if __name__ == "__main__":
    key = jax.random.PRNGKey(0)
    k_g, k_b, k1, k2, k3 = jax.random.split(key, 5)

    F = N_NUMERIC_FEATURES  # 15
    # PyTorch default init is gamma=1, beta=0; use seeded perturbations so the
    # affine path is actually exercised.
    gamma = 1.0 + 0.1 * jax.random.normal(k_g, (F,), dtype=jnp.float32)
    beta = 0.1 * jax.random.normal(k_b, (F,), dtype=jnp.float32)

    # (shape, tolerance): the lane-dense case uses a looser bound because the MXU
    # may evaluate f32 matmuls with reduced-precision passes on some generations;
    # structural errors (wrong segment sums) would be O(1), so 1e-2 still catches them.
    cases = [
        ((2, 8, F), 1e-5),     # 16 rows   -> lane-sparse path (small)
        ((3, 67, F), 1e-5),    # 201 rows  -> lane-sparse path, ragged / multi-step
        ((8, 128, F), 1e-2),   # 1024 rows -> lane-dense MXU path (rows % 128 == 0)
    ]
    for (shape, tol), k in zip(cases, (k1, k2, k3)):
        x = jax.random.normal(k, shape, dtype=jnp.float32)
        out = jax.block_until_ready(numeric_feature_extractor(x, gamma, beta))
        ref = _layernorm_ref(x, gamma, beta)
        assert out.shape == x.shape and out.dtype == x.dtype
        assert jnp.allclose(out, ref, atol=tol, rtol=tol), f"mismatch vs reference at {shape}"

    print("KERNEL_OK")
</pallas_src>

<mosaic_0001>
module attributes {stable_mosaic.version = 11 : i64} {
  func.func @_ln_rowtile_kernel(%arg0: i32, %arg1: memref<16x15xf32, #tpu.memory_space<vmem>>, %arg2: memref<1x15xf32, #tpu.memory_space<vmem>>, %arg3: memref<1x15xf32, #tpu.memory_space<vmem>>, %arg4: memref<16x15xf32, #tpu.memory_space<vmem>>) attributes {dimension_semantics = [#tpu.dimension_semantics<parallel>], iteration_bounds = array<i64: 1>, scalar_prefetch = 0 : i64, scratch_operands = 0 : i64, tpu.core_type = #tpu.core_type<tc>, window_params = [{transform_indices = @transform_0, window_bounds = array<i64: 16, 15>}, {pipeline_mode = #tpu.pipeline_mode<synchronous>, transform_indices = @transform_1, window_bounds = array<i64: 1, 15>}, {pipeline_mode = #tpu.pipeline_mode<synchronous>, transform_indices = @transform_2, window_bounds = array<i64: 1, 15>}, {transform_indices = @transform_3, window_bounds = array<i64: 16, 15>}]} {
    %c0 = arith.constant 0 : index
    %c0_0 = arith.constant 0 : index
    %0 = vector.load %arg1[%c0, %c0_0] : memref<16x15xf32, #tpu.memory_space<vmem>>, vector<16x15xf32>
    %cst = arith.constant dense<0.000000e+00> : vector<16xf32>
    %1 = vector.multi_reduction <add>, %0, %cst [1] : vector<16x15xf32> to vector<16xf32>
    %2 = vector.shape_cast %1 : vector<16xf32> to vector<16x1xf32>
    %cst_1 = arith.constant 0.0666666701 : f32
    %3 = vector.broadcast %cst_1 : f32 to vector<16x1xf32>
    %4 = arith.mulf %2, %3 : vector<16x1xf32>
    %5 = vector.broadcast %4 : vector<16x1xf32> to vector<16x15xf32>
    %6 = arith.subf %0, %5 : vector<16x15xf32>
    %7 = arith.mulf %6, %6 : vector<16x15xf32>
    %cst_2 = arith.constant dense<0.000000e+00> : vector<16xf32>
    %8 = vector.multi_reduction <add>, %7, %cst_2 [1] : vector<16x15xf32> to vector<16xf32>
    %9 = vector.shape_cast %8 : vector<16xf32> to vector<16x1xf32>
    %cst_3 = arith.constant 0.0666666701 : f32
    %10 = vector.broadcast %cst_3 : f32 to vector<16x1xf32>
    %11 = arith.mulf %9, %10 : vector<16x1xf32>
    %cst_4 = arith.constant 9.99999974E-6 : f32
    %12 = vector.broadcast %cst_4 : f32 to vector<16x1xf32>
    %13 = arith.addf %11, %12 : vector<16x1xf32>
    %14 = math.rsqrt %13 : vector<16x1xf32>
    %15 = vector.broadcast %14 : vector<16x1xf32> to vector<16x15xf32>
    %16 = arith.mulf %6, %15 : vector<16x15xf32>
    %c0_5 = arith.constant 0 : index
    %c0_6 = arith.constant 0 : index
    %17 = vector.load %arg2[%c0_5, %c0_6] : memref<1x15xf32, #tpu.memory_space<vmem>>, vector<1x15xf32>
    %18 = vector.broadcast %17 : vector<1x15xf32> to vector<16x15xf32>
    %19 = arith.mulf %16, %18 : vector<16x15xf32>
    %c0_7 = arith.constant 0 : index
    %c0_8 = arith.constant 0 : index
    %20 = vector.load %arg3[%c0_7, %c0_8] : memref<1x15xf32, #tpu.memory_space<vmem>>, vector<1x15xf32>
    %21 = vector.broadcast %20 : vector<1x15xf32> to vector<16x15xf32>
    %22 = arith.addf %19, %21 : vector<16x15xf32>
    %c0_9 = arith.constant 0 : index
    %c0_10 = arith.constant 0 : index
    %23 = vector.load %arg4[%c0_9, %c0_10] : memref<16x15xf32, #tpu.memory_space<vmem>>, vector<16x15xf32>
    tpu.vector_store %arg4[%c0_9, %c0_10], %22 {strides = array<i32>} : memref<16x15xf32, #tpu.memory_space<vmem>>, vector<16x15xf32>,
    return
  }
  func.func @transform_0(%arg0: i32) -> (i32, i32) {
    %c0_i32 = arith.constant 0 : i32
    %c0_i32_0 = arith.constant 0 : i32
    return %arg0, %c0_i32 : i32, i32
  }
  func.func @transform_1(%arg0: i32) -> (i32, i32) {
    %c0_i32 = arith.constant 0 : i32
    %c0_i32_0 = arith.constant 0 : i32
    %c0_i32_1 = arith.constant 0 : i32
    return %c0_i32, %c0_i32_0 : i32, i32
  }
  func.func @transform_2(%arg0: i32) -> (i32, i32) {
    %c0_i32 = arith.constant 0 : i32
    %c0_i32_0 = arith.constant 0 : i32
    %c0_i32_1 = arith.constant 0 : i32
    return %c0_i32, %c0_i32_0 : i32, i32
  }
  func.func @transform_3(%arg0: i32) -> (i32, i32) {
    %c0_i32 = arith.constant 0 : i32
    %c0_i32_0 = arith.constant 0 : i32
    return %arg0, %c0_i32 : i32, i32
  }
}

</mosaic_0001>

<bundles_post_ra>
// kernel: numeric_feature_extractor.1
= control target key start
LH: loop header
LB: loop body
LE: loop exit
PB: predicated region body
PF: predicated region fallthrough
CT: control target
= control target key end

     0   :  { %8 = vsyncpa [#allocation3], 0  ;;  %s197_s0 = inlined_call_operand.hbm [shape: f32[16,15], index: 0, kind: input, shape index: {}]   ;;  %s198_s1 = inlined_call_operand.vmem [shape: f32[1,15], index: 1, kind: input, shape index: {}]   ;;  %s199_s2 = inlined_call_operand.vmem [shape: f32[1,15], index: 2, kind: input, shape index: {}]   ;;  %s200_s3 = inlined_call_operand.hbm [shape: f32[16,15], index: 3, kind: output, shape index: {}]  }
   0x1   :  { %9 = vsyncpa [#allocation4], 0  ;;  %s149_s12 = smov [#allocation2]  }
   0x2   :  { %s15_s13 = sshll.u32 %s149_s12, 4  ;;  %s16_s13 = int_to_ptr.vmem [resolvable:$true] %s15_s13 }
   0x3   :  { %s113_s14 = scalar_lea.vmem %s16_s13, 256  ;;  %p118_p1 = scmp.lt.s32.totalorder %s16_s13, %s16_s13 }
   0x4   :  { %p114_p0 = scmp.ne.s32.totalorder %s16_s13, %s113_s14  ;;  %p119_p2 = scmp.lt.s32.totalorder %s113_s14, %s113_s14 }
   0x6   :  { %p120_p3 = por %p119_p2, %p118_p1 }
   0x8   :  { %p121_p4 = pnand %p120_p3, %p114_p0 }
   0xa   :  { %124 = shalt.err (!%p121_p4)
}
   0xb   :  { %s150_s15 = smov 128   ;;  %s151_s16 = smov 8  }
   0xc   :  { %21 = dma.hbm_to_vmem [thread:$0]  %s197_s0, 256, %s16_s13, [#allocation3], %s150_s15, %s150_s15, %s151_s16  }
   0xd   :  { %145 = dma.done.wait [#allocation3], 256  }
   0xe   :  { %146 = vsyncadd [#allocation3], 4294967040  ;;  %vm31_vm0 = vcmask 121856   ;;  %v29_v0 = vld [vmem:[#allocation2] sm:$0xff]  ;;  %v30_v1 = vld [vmem:[#allocation2 + $0x8] sm:$0xff]  ;;  %s152_s22 = smov [#allocation5]  }
   0xf   :  { %v32_v2 = vsel %vm31_vm0, %v29_v0, 0.0  ;;  %v35_v3 = vsel %vm31_vm0, %v30_v1, 0.0  ;;  %v95_v21 = vld [vmem:[%s198_s1] ss:$0 sm:$0xff]  ;;  %s83_s23 = sshll.u32 %s152_s22, 4  ;;  %s84_s23 = int_to_ptr.vmem [resolvable:$true] %s83_s23 }
  0x10   :  { %33 = vadd.xlane.f32.xlu0 %v32_v2  ;;  %v96_v23 = vld [vmem:[%s199_s2] ss:$0 sm:$0xff]  ;;  %s125_s24 = scalar_lea.vmem %s84_s23, 256  ;;  %p130_p6 = scmp.lt.s32.totalorder %s84_s23, %s84_s23 }
  0x11   :  { %p126_p5 = scmp.ne.s32.totalorder %s84_s23, %s125_s24  ;;  %p131_p7 = scmp.lt.s32.totalorder %s125_s24, %s125_s24 }
  0x13   :  { %p132_p8 = por %p131_p7, %p130_p6 }
  0x14   :  { %36 = vadd.xlane.f32.xlu0 %v35_v3 }
  0x15   :  { %p133_p9 = pnand %p132_p8, %p126_p5 }
  0x99   :  { %v34_v4 = vpop.xlane.xlu0 %33 }
  0x9a   :  { %v38_v5 = vmul.f32 0.06666667, %v34_v4 }
  0x9c   :  { %v40_v6 = vsub.f32 %v29_v0, %v38_v5 }
  0x9d   :  { %v37_v7 = vpop.xlane.xlu0 %36 }
  0x9e   :  { %v39_v8 = vmul.f32 0.06666667, %v37_v7  ;;  %v42_v9 = vmul.f32 %v40_v6, %v40_v6 }
  0xa0   :  { %v41_v10 = vsub.f32 %v30_v1, %v39_v8  ;;  %v44_v11 = vsel %vm31_vm0, %v42_v9, 0.0 }
  0xa1   :  { %45 = vadd.xlane.f32.xlu1 %v44_v11 }
  0xa2   :  { %v43_v12 = vmul.f32 %v41_v10, %v41_v10 }
  0xa4   :  { %v47_v13 = vsel %vm31_vm0, %v43_v12, 0.0 }
  0xa5   :  { %48 = vadd.xlane.f32.xlu1 %v47_v13 }
 0x12a   :  { %v46_v14 = vpop.xlane.xlu1 %45 }
 0x12b   :  { %v50_v15 = vmul.f32 0.06666667, %v46_v14 }
 0x12d   :  { %v52_v16 = vadd.f32 1e-05, %v50_v15 }
 0x12e   :  { %v49_v17 = vpop.xlane.xlu1 %48 }
 0x12f   :  { %101 = vrsqrt.f32 %v52_v16  ;;  %v51_v18 = vmul.f32 0.06666667, %v49_v17 }
 0x131   :  { %v53_v19 = vadd.f32 1e-05, %v51_v18 }
 0x133   :  { %103 = vrsqrt.f32 %v53_v19 }
 0x13c   :  { %v102_v20 = vpop.eup %101 }
 0x13d   :  { %v56_v22 = vmul.f32 %v102_v20, %v40_v6 }
 0x13f   :  { %v65_v24 = vmul.f32 %v95_v21, %v56_v22 }
 0x140   :  { %v104_v25 = vpop.eup %103 }
 0x141   :  { %v57_v26 = vmul.f32 %v104_v25, %v41_v10  ;;  %v74_v27 = vadd.f32 %v96_v23, %v65_v24 }
 0x143   :  { %v66_v28 = vmul.f32 %v95_v21, %v57_v26  ;;  %76 = vst.msk [vmem:[#allocation5] sm:$0xff] %vm31_vm0, %v74_v27 }
 0x145   :  { %v75_v29 = vadd.f32 %v96_v23, %v66_v28 }
 0x147   :  { %77 = vst.msk [vmem:[#allocation5 + $0x8] sm:$0xff] %vm31_vm0, %v75_v29 }
 0x148   :  { %136 = shalt.err (!%p133_p9)
}
 0x149   :  { %89 = dma.vmem_to_hbm [thread:$0]  %s84_s23, 256, %s200_s3, [#allocation4], %s150_s15, %s150_s15, %s151_s16  }
 0x14a   :  { %147 = dma.done.wait [#allocation4], 256  }
 0x14b   :  { %148 = vsyncadd [#allocation4], 4294967040 }
 0x14c   :  { %93 = vsyncpa [#allocation3], 1 }
 0x14d   :  { %94 = vsyncpa [#allocation4], 1 }

</bundles_post_ra>
